<compile_context>
chip_gen: v6e
topology: v6e:2x2x1
jax: 0.10.0
libtpu: 0.0.40
codegen_flags: <defaults>
</compile_context>

<pallas_src>
import jax
import jax.numpy as jnp
from jax.experimental import pallas as pl
from jax.experimental.pallas import tpu as pltpu


def _linreg_kernel(w_ref, b_ref, x_ref, o_ref):
    # w_ref / b_ref: (1,) f32 scalars in SMEM.  x_ref / o_ref: one (TM, TN) tile.
    w = w_ref[0]
    neg_b = -b_ref[0]
    # Compute in f32 (matches PyTorch's promotion with f32 params), cast back.
    o_ref[...] = (x_ref[...] * w + neg_b).astype(o_ref.dtype)


def _round_up(x: int, m: int) -> int:
    return ((x + m - 1) // m) * m


def _tm_target_for_device() -> int:
    """Bigger tiles on 128 MiB-VMEM parts (v5e/v6e); 512 rows on v7x (64 MiB)."""
    try:
        if pltpu.get_tpu_info().vmem_capacity_bytes >= 96 * 1024 * 1024:
            return 1024
    except Exception:
        pass
    return 512


def _pallas_linreg_2d(x2: jax.Array, w32: jax.Array, b32: jax.Array,
                      tm_target: int, tn_target: int) -> jax.Array:
    M, N = x2.shape
    sublane = 16 if jnp.dtype(x2.dtype).itemsize < 4 else 8
    TM = min(tm_target, _round_up(M, sublane))
    TN = min(tn_target, _round_up(N, 128))

    # Give v7x's two TensorCores at least 2 grid steps along a "parallel" axis.
    while TM >= 2 * sublane and pl.cdiv(M, TM) * pl.cdiv(N, TN) < 2:
        TM = max(sublane, ((TM // 2) // sublane) * sublane)

    # Ragged edges are handled by Pallas: boundary blocks are partially valid,
    # reads beyond the edge are harmless for this elementwise op and writes are
    # masked on writeback. No jnp.pad / slice round-trips.
    grid = (pl.cdiv(M, TM), pl.cdiv(N, TN))

    return pl.pallas_call(
        _linreg_kernel,
        out_shape=jax.ShapeDtypeStruct((M, N), x2.dtype),
        grid=grid,
        in_specs=[
            pl.BlockSpec(memory_space=pltpu.MemorySpace.SMEM),  # weights (1,)
            pl.BlockSpec(memory_space=pltpu.MemorySpace.SMEM),  # bias    (1,)
            pl.BlockSpec((TM, TN), lambda i, j: (i, j)),        # x tile (VMEM)
        ],
        out_specs=pl.BlockSpec((TM, TN), lambda i, j: (i, j)),  # y tile (VMEM)
        compiler_params=pltpu.CompilerParams(
            dimension_semantics=("parallel", "parallel"),
            vmem_limit_bytes=32 * 1024 * 1024,  # v7x-safe, ample for 2x(x+y) tiles
        ),
    )(w32, b32, x2)


def linear_regression_forward(
    x: jax.Array,
    weights: jax.Array,
    bias: jax.Array,
    *,
    tm_target: int | None = None,
    tn_target: int = 2048,
    min_bytes_for_pallas: int = 1 << 20,
) -> jax.Array:
    """y = weights * x - bias, with weights/bias of shape (1,). Any x rank."""
    orig_shape = x.shape
    w32 = jnp.asarray(weights).reshape((1,)).astype(jnp.float32)
    b32 = jnp.asarray(bias).reshape((1,)).astype(jnp.float32)

    # Tiny inputs: XLA's fused scalar multiply-add beats the pallas_call launch cost.
    if x.size * jnp.dtype(x.dtype).itemsize < min_bytes_for_pallas:
        return (w32[0] * x - b32[0]).astype(x.dtype)

    if tm_target is None:
        tm_target = _tm_target_for_device()

    if x.ndim >= 2 and x.shape[-1] >= 128:
        # Already lane-dense: merge leading dims (cheap reshape), no padding.
        x2 = x.reshape((-1, x.shape[-1]))
        out = _pallas_linreg_2d(x2, w32, b32, tm_target, tn_target)
        return out.reshape(orig_shape)

    # Narrow / 1-D inputs (typical (batch,) or (batch, 1)): flatten to a
    # lane-dense (rows, W) slab so loads/stores are full-width, then restore.
    W = min(tn_target, 1024)
    flat = x.reshape((-1,))
    T = flat.shape[0]
    Tp = _round_up(T, W)
    if Tp != T:
        flat = jnp.pad(flat, (0, Tp - T))  # at most W-1 extra elements
    x2 = flat.reshape((Tp // W, W))
    out = _pallas_linreg_2d(x2, w32, b32, tm_target, tn_target)
    return out.reshape((-1,))[:T].reshape(orig_shape)


if __name__ == "__main__":
    key = jax.random.PRNGKey(0)
    k_w, k_b, k1, k2, k3, k4 = jax.random.split(key, 6)

    # Deterministic "parameters" (PyTorch __init__ uses torch.rand(1)).
    weights = jax.random.uniform(k_w, (1,), dtype=jnp.float32)
    bias = jax.random.uniform(k_b, (1,), dtype=jnp.float32)

    def ref(x):
        return weights * x - bias

    cases = [
        jax.random.uniform(k1, (16, 256), dtype=jnp.float32),  # aligned 2-D path
        jax.random.uniform(k2, (10, 200), dtype=jnp.float32),  # ragged boundary tiles
        jax.random.uniform(k3, (37, 1), dtype=jnp.float32),    # (batch, 1) narrow path
        jax.random.uniform(k4, (300,), dtype=jnp.float32),     # 1-D path
    ]
    for x in cases:
        # Force the Pallas path even at these small test shapes.
        y = jax.block_until_ready(
            linear_regression_forward(x, weights, bias, min_bytes_for_pallas=0))
        assert y.shape == x.shape and y.dtype == x.dtype
        assert jnp.allclose(y, ref(x), atol=1e-6, rtol=1e-6)

    # Default dispatch (tiny input -> fused jnp fast path) also matches.
    y_small = jax.block_until_ready(linear_regression_forward(cases[0], weights, bias))
    assert jnp.allclose(y_small, ref(cases[0]), atol=1e-6, rtol=1e-6)

    print("KERNEL_OK")
</pallas_src>

<mosaic_0001>
module attributes {stable_mosaic.version = 11 : i64} {
  func.func @_linreg_kernel(%arg0: i32, %arg1: i32, %arg2: memref<1xf32, #tpu.memory_space<smem>>, %arg3: memref<1xf32, #tpu.memory_space<smem>>, %arg4: memref<8x256xf32, #tpu.memory_space<vmem>>, %arg5: memref<8x256xf32, #tpu.memory_space<vmem>>) attributes {dimension_semantics = [#tpu.dimension_semantics<parallel>, #tpu.dimension_semantics<parallel>], iteration_bounds = array<i64: 2, 1>, scalar_prefetch = 0 : i64, scratch_operands = 0 : i64, tpu.core_type = #tpu.core_type<tc>, window_params = [{transform_indices = @transform_0, window_bounds = array<i64: 1>}, {transform_indices = @transform_1, window_bounds = array<i64: 1>}, {transform_indices = @transform_2, window_bounds = array<i64: 8, 256>}, {transform_indices = @transform_3, window_bounds = array<i64: 8, 256>}]} {
    %c0 = arith.constant 0 : index
    %0 = memref.load %arg2[%c0] : memref<1xf32, #tpu.memory_space<smem>>
    %c0_0 = arith.constant 0 : index
    %1 = memref.load %arg3[%c0_0] : memref<1xf32, #tpu.memory_space<smem>>
    %cst = arith.constant 0.000000e+00 : f32
    %2 = arith.subf %cst, %1 : f32
    %c0_1 = arith.constant 0 : index
    %c0_2 = arith.constant 0 : index
    %3 = vector.load %arg4[%c0_1, %c0_2] : memref<8x256xf32, #tpu.memory_space<vmem>>, vector<8x256xf32>
    %4 = vector.broadcast %0 : f32 to vector<8x256xf32>
    %5 = arith.mulf %3, %4 : vector<8x256xf32>
    %6 = vector.broadcast %2 : f32 to vector<8x256xf32>
    %7 = arith.addf %5, %6 : vector<8x256xf32>
    %c0_3 = arith.constant 0 : index
    %c0_4 = arith.constant 0 : index
    %8 = vector.load %arg5[%c0_3, %c0_4] : memref<8x256xf32, #tpu.memory_space<vmem>>, vector<8x256xf32>
    tpu.vector_store %arg5[%c0_3, %c0_4], %7 {strides = array<i32>} : memref<8x256xf32, #tpu.memory_space<vmem>>, vector<8x256xf32>,
    return
  }
  func.func @transform_0(%arg0: i32, %arg1: i32) -> i32 {
    %c0_i32 = arith.constant 0 : i32
    %c0_i32_0 = arith.constant 0 : i32
    return %c0_i32 : i32
  }
  func.func @transform_1(%arg0: i32, %arg1: i32) -> i32 {
    %c0_i32 = arith.constant 0 : i32
    %c0_i32_0 = arith.constant 0 : i32
    return %c0_i32 : i32
  }
  func.func @transform_2(%arg0: i32, %arg1: i32) -> (i32, i32) {
    %c0_i32 = arith.constant 0 : i32
    return %arg0, %arg1 : i32, i32
  }
  func.func @transform_3(%arg0: i32, %arg1: i32) -> (i32, i32) {
    %c0_i32 = arith.constant 0 : i32
    return %arg0, %arg1 : i32, i32
  }
}

</mosaic_0001>

<bundles_post_ra>
// kernel: tpu_custom_call.1
= control target key start
LH: loop header
LB: loop body
LE: loop exit
PB: predicated region body
PF: predicated region fallthrough
CT: control target
= control target key end

     0   :  { %s680_s0 = inlined_call_operand.<no memory space> [shape: f32[1], index: 0, kind: input, shape index: {}]   ;;  %s681_s1 = inlined_call_operand.<no memory space> [shape: f32[1], index: 1, kind: input, shape index: {}]   ;;  %s682_s2 = inlined_call_operand.hbm [shape: f32[16,256], index: 2, kind: input, shape index: {}]   ;;  %s683_s3 = inlined_call_operand.hbm [shape: f32[16,256], index: 3, kind: output, shape index: {}]  }
   0x1   :  { %8 = sst [smem:[#allocation2]] %s680_s0 }
   0x2   :  { %9 = sst [smem:[#allocation3]] %s681_s1 }
   0x3   :  { %10 = vsyncpa [#allocation5], 0 }
   0x4   :  { %12 = vsyncpa [#allocation5 + $0x1], 0 }
   0x5   :  { %13 = vsyncpa [#allocation6], 0 }
   0x6   :  { %15 = vsyncpa [#allocation6 + $0x1], 0  ;;  %s540_s16 = smov 0   ;;  %s542_s17 = smov 0  }
   0x7   :  { %s544_s18 = smov 0   ;;  %s546_s19 = smov 0  }
   0x8   :  { %s548_s20 = smov 0   ;;  %s550_s21 = smov 0  }
   0x9 LB: > { %s323_s0 = sadd.s32 4294967295, %s510_s21   ;;  %s324_s1 = sadd.s32 4294967294, %s510_s21   ;;  %s510_s21 = sphi %s550_s21, %s21_s21   ;;  %s506_s20 = sphi %s548_s20, %s695_s20   ;;  %s502_s19 = sphi %s546_s19, %s694_s19   ;;  %s498_s18 = sphi %s544_s18, %s693_s18   ;;  %s494_s17 = sphi %s542_s17, %s692_s17   ;;  %s490_s16 = sphi %s540_s16, %s691_s16  }
   0xa   : > { %s33_s22 = sadd.s32 1, %s506_s20  ;;  %s84_s23 = sadd.s32 1, %s498_s18 }
   0xb   : > { %p35_p0 = scmp.ge.s32.totalorder %s33_s22, 2  ;;  %p91_p1 = scmp.ne.s32.totalorder %s498_s18, %s494_s17 }
   0xc   : > { %p92_p2 = scmp.eq.s32.totalorder %s510_s21, 0  ;;  %p97_p3 = scmp.ne.s32.totalorder %s494_s17, %s490_s16 }
   0xd   : > { %s697_s22 = smov (%p35_p0, %s33_s22), 0  ;;  %p98_p5 = scmp.eq.s32.totalorder %s323_s0, 0 }
   0xe   : > { %p581_p4 = por %p92_p2, %p91_p1  ;;  %s79_s25 = ssub.s32 %s506_s20, %s697_s22 }
   0xf   : > { %p123_p6 = scmp.eq.s32.totalorder %s323_s0, 1  ;;  %p82_p7 = scmp.eq.s32.totalorder %s79_s25, 0 }
  0x10   : > { %p587_p8 = por %p98_p5, %p97_p3  ;;  %p129_p10 = scmp.eq.s32.totalorder %s324_s1, 1 }
  0x11   : > { %p591_p9 = por %p123_p6, %p91_p1  ;;  %p352_p13 = scmp.lt.s32.totalorder %s510_s21, 2 }
  0x12   : > { %s596_s28 = scalar_select %p82_p7, %s498_s18, %s84_s23  }
  0x13   : > { %p598_p11 = por %p129_p10, %p97_p3  ;;  %s155_s30 = sand.u32 1, %s498_s18  }
  0x14   : > { %s327_s4 = sshll.u32 %s155_s30, 4  ;;  %s338_s5 = sshll.u32 %s506_s20, 8 }
  0x15   : > { %s687_s29 = scalar_select %p598_p11, 1, 0 }
  0x16   : > { %s167_s8 = scalar_lea.hbm %s682_s2, %s338_s5  ;;  %s159_s9 = scalar_lea.vmem [#allocation4], %s327_s4 }
  0x17   : > { %s169_s10 = sshll.u32 %s159_s9, 4  ;;  %p611_p0 = pnand %p352_p13, %p581_p4  ;;  %s170_s10 = int_to_ptr.vmem [resolvable:$true] %s169_s10 }
  0x18   : > { %p330_p1 = scmp.ge.s32.totalorder %s510_s21, 1  ;;  %p174_p2 = scmp.lt.s32.totalorder %s510_s21, 3 }
  0x19   : > { %s156_s12 = scalar_lea.sflag [#allocation5], %s155_s30  ;;  %p404_p3 = pneg %p611_p0 }
  0x1a   : > { %s415_s13 = scalar_lea.vmem %s170_s10, 256  ;;  %s512_s14 = smov [#allocation4]  }
  0x1b   : > { %p416_p5 = scmp.ne.s32.totalorder %s170_s10, %s415_s13  ;;  %s420_s15 = sshll.u32 %s512_s14, 4  ;;  %s421_s15 = int_to_ptr.vmem [resolvable:$false] %s420_s15 }
  0x1c   : > { %s422_s0 = scalar_lea.vmem %s421_s15, 512  ;;  %p423_p10 = scmp.lt.s32.totalorder %s170_s10, %s421_s15 }
  0x1d   : > { %p418_p6 = pnand %p416_p5, %p404_p3  ;;  %p424_p12 = scmp.lt.s32.totalorder %s422_s0, %s415_s13 }
  0x1f   : > { %p419_p7 = pneg %p418_p6  ;;  %p425_p4 = por %p424_p12, %p423_p10 }
  0x21   : > { %p426_p13 = pnand %p425_p4, %p419_p7 }
  0x23   : > { %429 = shalt.err (!%p426_p13)
}
  0x24   : > { %347 = dma.hbm_to_vmem [thread:$0]  (!%p611_p0), %s167_s8, 256, %s170_s10, %s156_s12  }
  0x25   : > { %p175_p11 = pnand %p330_p1, %p174_p2 }
  0x26   : > { %s626_s1 = sand.u32 (!%p175_p11), 1, %s494_s17  }
  0x27   : > { %178 = sbr.rel (%p175_p11) target bundleno = 71 (0x47), region = 32  ;;  %s331_s23 = sshll.u32 (!%p175_p11), %s626_s1, 4 }
  0x28   : > { %s181_s24 = scalar_lea.sflag (!%p175_p11), [#allocation5], %s626_s1  ;;  %s184_s25 = scalar_lea.vmem (!%p175_p11), [#allocation4], %s331_s23 }
  0x2c   : > { %481 = dma.done.wait (%p587_p8), %s181_s24, 256  }
  0x2d   : > { %483 = vsyncadd (%p587_p8), %s181_s24, 4294967040  ;;  %s209_s30 = sld [smem:[#allocation2]]  ;;  %v212_v0 = vld [vmem:[%s184_s25] sm:$0xff]  ;;  %s206_s5 = scalar_lea.vmem [#allocation7], %s331_s23  ;;  %v213_v2 = vld [vmem:[%s184_s25 + $0x8] sm:$0xff] }
  0x2e   : > { %s210_s4 = sld [smem:[#allocation3]]  ;;  %s239_s6 = sshll.u32 %s206_s5, 4  ;;  %s635_s6 = int_to_ptr.vmem [resolvable:$true] %s239_s6 }
  0x2f   : > { %s339_s8 = sshll.u32 %s502_s19, 8  ;;  %s223_s11 = scalar_lea.sflag [#allocation6], %s626_s1 }
  0x30   : > { %s237_s10 = scalar_lea.hbm %s683_s3, %s339_s8  ;;  %s430_s12 = scalar_lea.vmem %s635_s6, 256 }
  0x31   : > { %p431_p8 = scmp.ne.s32.totalorder %s635_s6, %s430_s12  ;;  %s513_s19 = smov [#allocation7]  }
  0x32   : > { %s434_s13 = sshll.u32 %s513_s19, 4  ;;  %s435_s13 = int_to_ptr.vmem [resolvable:$false] %s434_s13 }
  0x33   : > { %v214_v1 = vstv %s209_s30  ;;  %p432_p11 = pnand %p431_p8, %p591_p9  ;;  %s436_s14 = scalar_lea.vmem %s435_s13, 512 }
  0x34   : > { %s211_s7 = ssub.f32 0.0, %s210_s4  ;;  %v215_v3 = vmul.f32 %v214_v1, %v212_v0  ;;  %v216_v4 = vmul.f32 %v214_v1, %v213_v2  ;;  %p437_p0 = scmp.lt.s32.totalorder %s635_s6, %s435_s13 }
  0x35   : > { %p433_p12 = pneg %p432_p11  ;;  %p438_p1 = scmp.lt.s32.totalorder %s436_s14, %s430_s12 }
  0x36   : > { %v217_v5 = vstv %s211_s7 }
  0x37   : > { %v218_v6 = vadd.f32 %v217_v5, %v215_v3  ;;  %v219_v7 = vadd.f32 %v217_v5, %v216_v4  ;;  %p439_p2 = por %p438_p1, %p437_p0 }
  0x39   : > { %220 = vst [vmem:[%s206_s5] sm:$0xff] %v218_v6  ;;  %221 = vst [vmem:[%s206_s5 + $0x8] sm:$0xff] %v219_v7  ;;  %p440_p3 = pnand %p439_p2, %p433_p12 }
  0x3b   : > { %443 = shalt.err (!%p440_p3)
}
  0x3c   : > { %s444_s15 = scalar_lea.hbm %s237_s10, 256  ;;  %s448_s23 = scalar_lea.hbm %s683_s3, 512 }
  0x3d   : > { %p445_p5 = scmp.ne.s32.totalorder %s237_s10, %s444_s15  ;;  %p449_p10 = scmp.lt.s32.totalorder %s237_s10, %s683_s3 }
  0x3e   : > { %p450_p4 = scmp.lt.s32.totalorder %s448_s23, %s444_s15 }
  0x3f   : > { %p446_p6 = pnand %p445_p5, %p591_p9 }
  0x40   : > { %p451_p13 = por %p450_p4, %p449_p10 }
  0x41   : > { %p447_p7 = pneg %p446_p6 }
  0x43   : > { %p452_p8 = pnand %p451_p13, %p447_p7 }
  0x45   : > { %455 = shalt.err (!%p452_p8)
}
  0x46   : > { %342 = dma.vmem_to_hbm [thread:$0]  (%p591_p9), %s635_s6, 256, %s237_s10, %s223_s11  }
  0x47 PF: > { %s251_s30 = sand.u32 1, %s490_s16   ;;  %p689_p11 = scmp.ne.s32.totalorder %s687_s29, 0 }
  0x48   : > { %p690_p12 = scmp.ge.s32.totalorder %s510_s21, 2  ;;  %s252_s4 = scalar_lea.sflag [#allocation6], %s251_s30 }
  0x4a   : > { %p349_p0 = pnand %p690_p12, %p689_p11 }
  0x4c   : > { %p350_p1 = pneg %p349_p0 }
  0x4e   : > { %485 = dma.done.wait (%p350_p1), %s252_s4, 256  }
  0x4f   : > { %487 = vsyncadd (%p350_p1), %s252_s4, 4294967040  ;;  %s21_s21 = sadd.s32 1, %s510_s21   ;;  %s691_s16 = smov %s494_s17 }
  0x50   : > { %p18_p2 = scmp.ge.s32.totalorder %s21_s21, 4   ;;  %s692_s17 = smov %s498_s18 }
  0x51   : > { %s693_s18 = smov %s596_s28  ;;  %s694_s19 = smov %s506_s20 }
  0x52   : > { %s695_s20 = smov %s697_s22  ;;  %20 = sbr.rel (!%p18_p2) target bundleno = 9 (0x9), region = 77 }
  0x57   :  { %257 = vsyncpa [#allocation5], 1 }
  0x58   :  { %259 = vsyncpa [#allocation5 + $0x1], 1 }
  0x59   :  { %260 = vsyncpa [#allocation6], 1 }
  0x5a   :  { %262 = vsyncpa [#allocation6 + $0x1], 1 }

</bundles_post_ra>
